<compile_context>
chip_gen: v7x
topology: tpu7x:2x2x1
jax: 0.10.0
libtpu: 0.0.40
codegen_flags: <defaults>
</compile_context>

<pallas_src>
import math

import jax
import jax.numpy as jnp
from jax import lax
from jax.experimental import pallas as pl
from jax.experimental.pallas import tpu as pltpu

_LANES = 128
_INV_SQRT2 = 1.0 / math.sqrt(2.0)
_SQRT_2_OVER_PI = math.sqrt(2.0 / math.pi)


# ---------------------------------------------------------------------------
# Chip-generation-aware pipeline parameters.
# ---------------------------------------------------------------------------
def _tpu_generation() -> str:
    try:
        kind = jax.devices()[0].device_kind.lower()
    except Exception:
        return "unknown"
    for tag in ("v7", "v6", "v5"):
        if tag in kind:
            return tag
    return "unknown"


def _pipeline_params():
    """Returns (per-buffer byte budget, vmem_limit_bytes, minimum grid steps)."""
    gen = _tpu_generation()
    if gen == "v7":
        # 64 MiB physical VMEM, 2 TCs/chip: ~4 MiB/buffer keeps the
        # double-buffered in+out footprint (~16 MiB) under the 32 MiB scoped
        # default; keep >= 4 grid steps so both TensorCores get work.
        return 4 << 20, 32 << 20, 4
    if gen in ("v5", "v6"):
        # 128 MiB physical VMEM, single TC: ~8 MiB/buffer (~32 MiB footprint),
        # explicitly raise the scoped-VMEM limit past the 16/32 MiB defaults.
        return 8 << 20, 48 << 20, 1
    # Unknown chip: conservative middle ground.
    return 4 << 20, 32 << 20, 2


# ---------------------------------------------------------------------------
# Layout helpers.
# ---------------------------------------------------------------------------
def _sublane_rows(dtype) -> int:
    # Min second-to-last tile dim: 8 for 32-bit, 16 for bf16, 32 for int8/fp8.
    return max(8, 32 // jnp.dtype(dtype).itemsize)


def _choose_lane_width(n_bulk: int) -> int:
    """Widest lane-dense width dividing the (128-aligned) bulk element count."""
    for w in (2048, 1024, 512, 256, _LANES):
        if n_bulk % w == 0:
            return w
    return _LANES  # unreachable: n_bulk is a multiple of 128


def _choose_tile_rows(rows, w, itemsize, sublane, block_bytes, min_steps):
    # Rows per block from the per-buffer byte budget, rounded to the dtype's
    # sublane multiple.
    t = max(sublane, (block_bytes // (w * itemsize)) // sublane * sublane)
    # v7x megacore: cap the tile so the "parallel" grid has >= min_steps steps.
    if min_steps > 1 and rows > sublane:
        cap = max(sublane, pl.cdiv(rows, min_steps) // sublane * sublane)
        t = min(t, cap)
    if rows <= t:
        return rows  # single full-extent block (always a legal block shape)
    return t         # ragged last block (if any) is masked by Pallas


# ---------------------------------------------------------------------------
# Kernels.  Compute stays in the input dtype; constants are weakly typed.
# ---------------------------------------------------------------------------
def _gelu_cdf(x, approximate: bool):
    if approximate:
        # tanh-approx GELU: jnp.tanh uses the EUP slot (off the VALU) — the
        # recommended formulation for the blended path on v7x.  Numerics differ
        # slightly from torch.nn.GELU(approximate='none').
        return 0.5 * (1.0 + jnp.tanh(_SQRT_2_OVER_PI * (x + 0.044715 * x * x * x)))
    # Exact erf-based GELU (matches torch.nn.GELU default).
    return 0.5 * (1.0 + lax.erf(x * _INV_SQRT2))


def _relu_kernel(x_ref, o_ref):
    x = x_ref[...]
    o_ref[...] = jnp.maximum(x, jnp.zeros_like(x))


def _make_gelu_kernel(approximate: bool):
    def kernel(x_ref, o_ref):
        x = x_ref[...]
        o_ref[...] = (x * _gelu_cdf(x, approximate)).astype(o_ref.dtype)
    return kernel


def _make_blended_kernel(b: float, approximate: bool):
    c1 = float(1.0 - b)
    c2 = float(b)

    def kernel(x_ref, o_ref):
        x = x_ref[...]
        o1 = jnp.maximum(x, jnp.zeros_like(x))
        o2 = x * _gelu_cdf(x, approximate)
        o_ref[...] = (c1 * o1 + c2 * o2).astype(o_ref.dtype)
    return kernel


def _make_dynamic_blended_kernel(approximate: bool):
    # Traced blending: scalar lives in SMEM; compute in f32 for stability.
    def kernel(blend_ref, x_ref, o_ref):
        x = x_ref[...].astype(jnp.float32)
        b = blend_ref[0]
        o1 = jnp.maximum(x, 0.0)
        o2 = x * _gelu_cdf(x, approximate)
        o_ref[...] = (o1 + b * (o2 - o1)).astype(o_ref.dtype)
    return kernel


# ---------------------------------------------------------------------------
# Plain-jnp fallback for tiny (<128 element) tails.
# ---------------------------------------------------------------------------
def _jnp_blend(x, blending, approximate: bool):
    x32 = x.astype(jnp.float32)
    o1 = jnp.maximum(x32, 0.0)
    o2 = jax.nn.gelu(x32, approximate=approximate)
    b = jnp.asarray(blending, jnp.float32)
    return (o1 * (1.0 - b) + o2 * b).astype(x.dtype)


# ---------------------------------------------------------------------------
# Public wrapper.
# ---------------------------------------------------------------------------
def blended_activation(x: jax.Array, blending=0.0, approximate_gelu: bool = False) -> jax.Array:
    """relu(x) * (1 - blending) + gelu(x) * blending, elementwise, any shape."""
    orig_shape, dtype, n = x.shape, x.dtype, x.size
    if n == 0:
        return x

    # Static (Python / concrete) blending is baked into the kernel; a traced
    # blending value goes through the SMEM-scalar kernel.
    try:
        b_static = float(blending)
        is_static = True
    except Exception:
        b_static, is_static = None, False

    flat = x.reshape(-1)
    bulk = (n // _LANES) * _LANES
    if bulk == 0:
        # Fewer than 128 elements: a kernel launch is pure overhead.
        return _jnp_blend(flat, blending, approximate_gelu).reshape(orig_shape)

    bulk_flat = flat if bulk == n else flat[:bulk]
    w = _choose_lane_width(bulk)
    rows = bulk // w
    x2d = bulk_flat.reshape(rows, w)

    block_bytes, vmem_limit, min_steps = _pipeline_params()
    itemsize = jnp.dtype(dtype).itemsize
    sublane = _sublane_rows(dtype)
    tile_rows = _choose_tile_rows(rows, w, itemsize, sublane, block_bytes, min_steps)

    grid = (pl.cdiv(rows, tile_rows),)
    blk = pl.BlockSpec((tile_rows, w), lambda i: (i, 0))
    cparams = pltpu.CompilerParams(
        dimension_semantics=("parallel",),
        vmem_limit_bytes=vmem_limit,
    )
    bytes_accessed = 2 * bulk * itemsize

    if is_static and b_static == 0.0:
        # Module default: pure ReLU hot path (no transcendental at all).
        kernel = _relu_kernel
        in_specs, args = [blk], (x2d,)
        cost = pl.CostEstimate(flops=bulk, transcendentals=0, bytes_accessed=bytes_accessed)
    elif is_static and b_static == 1.0:
        kernel = _make_gelu_kernel(approximate_gelu)
        in_specs, args = [blk], (x2d,)
        cost = pl.CostEstimate(flops=6 * bulk, transcendentals=bulk, bytes_accessed=bytes_accessed)
    elif is_static:
        kernel = _make_blended_kernel(b_static, approximate_gelu)
        in_specs, args = [blk], (x2d,)
        cost = pl.CostEstimate(flops=9 * bulk, transcendentals=bulk, bytes_accessed=bytes_accessed)
    else:
        kernel = _make_dynamic_blended_kernel(approximate_gelu)
        blend_arr = jnp.asarray(blending, dtype=jnp.float32).reshape(1)
        in_specs = [pl.BlockSpec(memory_space=pltpu.SMEM), blk]
        args = (blend_arr, x2d)
        cost = pl.CostEstimate(flops=10 * bulk, transcendentals=bulk,
                               bytes_accessed=bytes_accessed + 4)

    out2d = pl.pallas_call(
        kernel,
        out_shape=jax.ShapeDtypeStruct((rows, w), dtype),
        grid=grid,
        in_specs=in_specs,
        out_specs=blk,
        compiler_params=cparams,
        cost_estimate=cost,
    )(*args)

    if bulk == n:
        return out2d.reshape(orig_shape)
    # Ragged tail (< 128 elements): plain jnp, then stitch back together.
    tail = _jnp_blend(flat[bulk:], blending, approximate_gelu)
    return jnp.concatenate([out2d.reshape(-1), tail]).reshape(orig_shape)


# ---------------------------------------------------------------------------
# Reference + self-test.
# ---------------------------------------------------------------------------
def _reference(x: jax.Array, blending: float) -> jax.Array:
    o1 = jax.nn.relu(x)
    o2 = jax.nn.gelu(x, approximate=False)
    return o1 * (1.0 - blending) + o2 * blending


if __name__ == "__main__":
    key = jax.random.PRNGKey(0)
    # NCHW input, as the PyTorch conv convention implies.
    x = jax.random.normal(key, (2, 4, 16, 16), dtype=jnp.float32)

    # Static blends: 0.0 (module default -> ReLU path), 0.3 (blended), 1.0 (GELU).
    for blend in (0.0, 0.3, 1.0):
        out = jax.block_until_ready(blended_activation(x, blending=blend))
        ref = _reference(x, blend)
        assert out.shape == x.shape and out.dtype == x.dtype
        assert jnp.allclose(out, ref, atol=1e-5, rtol=1e-5), f"mismatch at blending={blend}"

    # Traced blending (e.g. annealed during training) -> SMEM-scalar kernel.
    out_dyn = jax.block_until_ready(
        jax.jit(lambda xx, bb: blended_activation(xx, bb))(x, jnp.float32(0.3)))
    assert jnp.allclose(out_dyn, _reference(x, 0.3), atol=1e-5, rtol=1e-5)

    # Ragged element count (not divisible by 128): kernel handles the bulk,
    # the tiny tail runs in plain jnp — no pad/slice full-tensor passes.
    x2 = jax.random.normal(jax.random.PRNGKey(0), (3, 5, 7, 11), dtype=jnp.float32)
    out2 = jax.block_until_ready(blended_activation(x2, blending=0.25))
    assert jnp.allclose(out2, _reference(x2, 0.25), atol=1e-5, rtol=1e-5)

    # bf16: compute stays in the input dtype (per-dtype sublane handling).
    xb = x.astype(jnp.bfloat16)
    outb = jax.block_until_ready(blended_activation(xb, blending=0.3))
    refb = _reference(xb.astype(jnp.float32), 0.3)
    assert outb.dtype == jnp.bfloat16
    assert jnp.allclose(outb.astype(jnp.float32), refb, atol=1e-1, rtol=1e-1)

    print("KERNEL_OK")
</pallas_src>

<mosaic_0001>
module attributes {stable_mosaic.version = 11 : i64} {
  func.func @_relu_kernel(%arg0: i32, %arg1: memref<1x2048xf32, #tpu.memory_space<vmem>>, %arg2: memref<1x2048xf32, #tpu.memory_space<vmem>>) attributes {dimension_semantics = [#tpu.dimension_semantics<parallel>], iteration_bounds = array<i64: 1>, scalar_prefetch = 0 : i64, scratch_operands = 0 : i64, tpu.core_type = #tpu.core_type<tc>, window_params = [{transform_indices = @transform_0, window_bounds = array<i64: 1, 2048>}, {transform_indices = @transform_1, window_bounds = array<i64: 1, 2048>}]} {
    %c0 = arith.constant 0 : index
    %c0_0 = arith.constant 0 : index
    %0 = vector.load %arg1[%c0, %c0_0] : memref<1x2048xf32, #tpu.memory_space<vmem>>, vector<1x2048xf32>
    %cst = arith.constant 0.000000e+00 : f32
    %1 = vector.broadcast %cst : f32 to vector<1x2048xf32>
    %2 = arith.maximumf %0, %1 : vector<1x2048xf32>
    %c0_1 = arith.constant 0 : index
    %c0_2 = arith.constant 0 : index
    %3 = vector.load %arg2[%c0_1, %c0_2] : memref<1x2048xf32, #tpu.memory_space<vmem>>, vector<1x2048xf32>
    tpu.vector_store %arg2[%c0_1, %c0_2], %2 {strides = array<i32>} : memref<1x2048xf32, #tpu.memory_space<vmem>>, vector<1x2048xf32>,
    return
  }
  func.func @transform_0(%arg0: i32) -> (i32, i32) {
    %c0_i32 = arith.constant 0 : i32
    %c0_i32_0 = arith.constant 0 : i32
    return %arg0, %c0_i32 : i32, i32
  }
  func.func @transform_1(%arg0: i32) -> (i32, i32) {
    %c0_i32 = arith.constant 0 : i32
    %c0_i32_0 = arith.constant 0 : i32
    return %arg0, %c0_i32 : i32, i32
  }
}

</mosaic_0001>

<bundles_post_ra>
// kernel: tpu_custom_call.1
= control target key start
LH: loop header
LB: loop body
LE: loop exit
PB: predicated region body
PF: predicated region fallthrough
CT: control target
= control target key end

     0   :  { %6 = vsyncpa [#allocation3], 0  ;;  %s128_s0 = inlined_call_operand.hbm [shape: f32[1,2048], index: 0, kind: input, shape index: {}]   ;;  %s129_s1 = inlined_call_operand.hbm [shape: f32[1,2048], index: 1, kind: output, shape index: {}]  }
   0x1   :  { %7 = vsyncpa [#allocation4], 0  ;;  %s92_s6 = smov [#allocation2]   ;;  %s44_s10 = scalar_lea.hbm %s128_s0, 256 }
   0x2   :  { %s14_s7 = sshll.u32 %s92_s6, 4  ;;  %p45_p0 = scmp.ne.s32.totalorder %s128_s0, %s44_s10  ;;  %s15_s7 = int_to_ptr.vmem [resolvable:$true] %s14_s7 }
   0x3   :  { %p48_p1 = scmp.lt.u32.totalorder %s44_s10, %s128_s0 }
   0x5   :  { %p50_p2 = pnand %p48_p1, %p45_p0 }
   0x7   :  { %53 = shalt.err (!%p50_p2)
}
   0x8   :  { %s54_s15 = scalar_lea.vmem %s15_s7, 256  ;;  %p59_p4 = scmp.lt.s32.totalorder %s15_s7, %s15_s7 }
   0x9   :  { %p55_p3 = scmp.ne.s32.totalorder %s15_s7, %s54_s15  ;;  %p60_p5 = scmp.lt.s32.totalorder %s54_s15, %s54_s15 }
   0xb   :  { %p61_p6 = por %p60_p5, %p59_p4 }
   0xd   :  { %p62_p7 = pnand %p61_p6, %p55_p3 }
   0xf   :  { %65 = shalt.err (!%p62_p7)
}
  0x10   :  { %17 = dma.hbm_to_vmem [thread:$0]  %s128_s0, 256, %s15_s7, [#allocation3]  }
  0x11   :  { %88 = dma.done.wait [#allocation3], 256  }
  0x12   :  { %89 = vsyncadd [#allocation3], 4294967040  ;;  %s93_s18 = smov [#allocation5]   ;;  %v21_v0 = vld [vmem:[#allocation2] sm:$0xff]  ;;  %v22_v1 = vld [vmem:[#allocation2 + $0x8] sm:$0xff] }
  0x13   :  { %s33_s19 = sshll.u32 %s93_s18, 4  ;;  %v23_v2 = vmax.f32 %v21_v0, 0.0  ;;  %v24_v3 = vmax.f32 %v22_v1, 0.0  ;;  %s34_s19 = int_to_ptr.vmem [resolvable:$true] %s33_s19 }
  0x14   :  { %s66_s20 = scalar_lea.vmem %s34_s19, 256  ;;  %p71_p9 = scmp.lt.s32.totalorder %s34_s19, %s34_s19 }
  0x15   :  { %25 = vst [vmem:[#allocation5] sm:$0xff] %v23_v2  ;;  %26 = vst [vmem:[#allocation5 + $0x8] sm:$0xff] %v24_v3  ;;  %p67_p8 = scmp.ne.s32.totalorder %s34_s19, %s66_s20  ;;  %p72_p10 = scmp.lt.s32.totalorder %s66_s20, %s66_s20 }
  0x17   :  { %p73_p11 = por %p72_p10, %p71_p9 }
  0x19   :  { %p74_p12 = pnand %p73_p11, %p67_p8 }
  0x1b   :  { %77 = shalt.err (!%p74_p12)
}
  0x1c   :  { %s78_s22 = scalar_lea.hbm %s129_s1, 256 }
  0x1d   :  { %p79_p13 = scmp.ne.s32.totalorder %s129_s1, %s78_s22  ;;  %p82_p0 = scmp.lt.u32.totalorder %s78_s22, %s129_s1 }
  0x1f   :  { %p84_p1 = pnand %p82_p0, %p79_p13 }
  0x21   :  { %87 = shalt.err (!%p84_p1)
}
  0x22   :  { %36 = dma.vmem_to_hbm [thread:$0]  %s34_s19, 256, %s129_s1, [#allocation4]  }
  0x23   :  { %90 = dma.done.wait [#allocation4], 256  }
  0x24   :  { %91 = vsyncadd [#allocation4], 4294967040 }
  0x25   :  { %40 = vsyncpa [#allocation3], 1 }
  0x26   :  { %41 = vsyncpa [#allocation4], 1 }

</bundles_post_ra>
